<compile_context>
chip_gen: v7x
topology: tpu7x:2x2x1
jax: 0.10.0
libtpu: 0.0.40
codegen_flags: <defaults>
</compile_context>

<pallas_src>
import functools

import jax
import jax.numpy as jnp
from jax.experimental import pallas as pl
from jax.experimental.pallas import tpu as pltpu

# Hyperparameters (module __init__ defaults). `crash_weight` is unused in the
# PyTorch forward, so it is unused here as well.
THRESHOLD = 1.5
CRASH_WEIGHT = 2.0  # kept for parity with __init__; not used in forward
ALPHA = 0.6

# Per-element weights of the fused reduction: total = sum(w_i * term_i) / B.
_W_VALUE = ALPHA
_W_PROB = (1.0 - ALPHA) * 0.4
_W_CRASH = (1.0 - ALPHA) * 0.3
_W_CONF = (1.0 - ALPHA) * 0.3

# PyTorch's nn.BCELoss clamps log terms at -100 for numerical stability.
_BCE_LOG_CLAMP = -100.0

_LANES = 128
# 5 planes * 2048 rows * 128 lanes * 4 B = 5.2 MiB per tile; x2 pipeline
# buffers ~ 10.5 MiB -> fits the default scoped VMEM on v5e/v6e/v7x.
_MAX_TILE_ROWS = 2048

# Plane order inside the stacked input.
_V, _P, _C, _CF, _T = range(5)


def _jetx_tft_loss_kernel(x_ref, out_ref, acc_ref, *, inv_b):
    """x_ref: (5, tile_rows, 128) f32 VMEM block.
    out_ref: (1, 1) f32 in SMEM (scalar result).
    acc_ref: (1,) f32 SMEM scratch, persists across grid steps."""
    i = pl.program_id(0)

    @pl.when(i == 0)
    def _():
        acc_ref[0] = 0.0

    v = x_ref[_V]        # (tile_rows, 128)
    p = x_ref[_P]
    c = x_ref[_C]
    conf = x_ref[_CF]
    t = x_ref[_T]

    # prob target == 1  <=>  crash target == 0 (comparisons are complementary).
    above = t >= THRESHOLD

    # value_loss: MSE(value, targets) -- per-element squared error.
    dv = v - t
    per_elem = _W_VALUE * (dv * dv)

    # prob_loss: BCE(probability, (t >= thr)) with one log per element.
    # (padded lanes: p=0, above=False -> q_p=1 -> log(1)=0 contribution)
    q_p = jnp.where(above, p, 1.0 - p)
    per_elem += _W_PROB * (-jnp.maximum(jnp.log(q_p), _BCE_LOG_CLAMP))

    # crash_loss: BCE(crash_risk, (t < thr)); crash target = 1 - prob target.
    # (padded lanes: c=1, above=False -> q_c=1 -> 0 contribution)
    q_c = jnp.where(above, 1.0 - c, c)
    per_elem += _W_CRASH * (-jnp.maximum(jnp.log(q_c), _BCE_LOG_CLAMP))

    # confidence_loss: MSE(confidence, 1 - |v - t| / clamp(t, 0.1)).
    # (padded lanes: v=t=0 -> pred_acc=1, conf=1 -> 0 contribution)
    pred_acc = 1.0 - jnp.abs(dv) / jnp.maximum(t, 0.1)
    dcf = conf - pred_acc
    per_elem += _W_CONF * (dcf * dcf)

    # Single fused reduction; accumulate across grid steps in SMEM.
    acc_ref[0] += jnp.sum(per_elem)

    @pl.when(i == pl.num_programs(0) - 1)
    def _():
        out_ref[0, 0] = acc_ref[0] * inv_b


def jetx_tft_loss(predictions, targets):
    """predictions: dict with 'value', 'probability', 'crash_risk',
    'confidence' -- each of shape (B,) or (B, 1). targets: shape (B,)."""
    v = jnp.asarray(predictions["value"], jnp.float32).reshape(-1)
    p = jnp.asarray(predictions["probability"], jnp.float32).reshape(-1)
    c = jnp.asarray(predictions["crash_risk"], jnp.float32).reshape(-1)
    conf = jnp.asarray(predictions["confidence"], jnp.float32).reshape(-1)
    t = jnp.asarray(targets, jnp.float32).reshape(-1)
    B = t.shape[0]

    # Rows of 128 lanes, padded so rows % 8 == 0 (full (8,128) f32 tiles).
    rows = -(-B // _LANES)
    rows = max(8, ((rows + 7) // 8) * 8)
    if rows > _MAX_TILE_ROWS:
        tile_rows = _MAX_TILE_ROWS
        rows = ((rows + tile_rows - 1) // tile_rows) * tile_rows
    else:
        tile_rows = rows
    num_tiles = rows // tile_rows
    b_pad = rows * _LANES

    def _pad2d(x, fill):
        # Pad values are chosen so padded elements contribute exactly 0 loss.
        x = jnp.pad(x, (0, b_pad - B), constant_values=fill)
        return x.reshape(rows, _LANES)

    stacked = jnp.stack(
        [
            _pad2d(v, 0.0),     # value
            _pad2d(p, 0.0),     # probability (target 0 -> q = 1 - 0 = 1)
            _pad2d(c, 1.0),     # crash_risk  (target 1 -> q = 1)
            _pad2d(conf, 1.0),  # confidence  (pred_acc on pad = 1)
            _pad2d(t, 0.0),     # targets
        ],
        axis=0,
    )  # (5, rows, 128)

    kernel = functools.partial(_jetx_tft_loss_kernel, inv_b=1.0 / float(B))

    out = pl.pallas_call(
        kernel,
        out_shape=jax.ShapeDtypeStruct((1, 1), jnp.float32),
        grid_spec=pltpu.PrefetchScalarGridSpec(
            num_scalar_prefetch=0,
            grid=(num_tiles,),
            in_specs=[
                pl.BlockSpec((5, tile_rows, _LANES), lambda i: (0, i, 0)),
            ],
            out_specs=pl.BlockSpec(memory_space=pltpu.MemorySpace.SMEM),
            scratch_shapes=[pltpu.SMEM((1,), jnp.float32)],
        ),
        compiler_params=pltpu.CompilerParams(
            dimension_semantics=("arbitrary",),
        ),
    )(stacked)
    return out[0, 0]


def _reference_loss(predictions, targets):
    """Pure-JAX reference (mirrors the PyTorch forward) for sanity checking."""
    v = jnp.asarray(predictions["value"], jnp.float32).reshape(-1)
    p = jnp.asarray(predictions["probability"], jnp.float32).reshape(-1)
    c = jnp.asarray(predictions["crash_risk"], jnp.float32).reshape(-1)
    conf = jnp.asarray(predictions["confidence"], jnp.float32).reshape(-1)
    t = jnp.asarray(targets, jnp.float32).reshape(-1)

    value_loss = jnp.mean((v - t) ** 2)
    thr_t = (t >= THRESHOLD).astype(jnp.float32)
    bce = lambda pred, tgt: jnp.mean(
        -(tgt * jnp.maximum(jnp.log(pred), _BCE_LOG_CLAMP)
          + (1.0 - tgt) * jnp.maximum(jnp.log(1.0 - pred), _BCE_LOG_CLAMP)))
    prob_loss = bce(p, thr_t)
    crash_t = (t < THRESHOLD).astype(jnp.float32)
    crash_loss = bce(c, crash_t)
    pred_acc = 1.0 - jnp.abs(v - t) / jnp.maximum(t, 0.1)
    confidence_loss = jnp.mean((conf - pred_acc) ** 2)
    return (ALPHA * value_loss
            + (1 - ALPHA) * 0.4 * prob_loss
            + (1 - ALPHA) * 0.3 * crash_loss
            + (1 - ALPHA) * 0.3 * confidence_loss)


def _make_inputs(key, batch):
    k_v, k_p, k_c, k_conf, k_t = jax.random.split(key, 5)
    # Predictions as the TFT head would emit: (B, 1) each.
    value = 1.0 + jnp.abs(jax.random.normal(k_v, (batch, 1), jnp.float32))
    probability = jax.nn.sigmoid(jax.random.normal(k_p, (batch, 1), jnp.float32))
    crash_risk = jax.nn.sigmoid(jax.random.normal(k_c, (batch, 1), jnp.float32))
    confidence = jax.nn.sigmoid(jax.random.normal(k_conf, (batch, 1), jnp.float32))
    targets = 1.0 + jnp.abs(jax.random.normal(k_t, (batch,), jnp.float32))
    preds = {
        "value": value,
        "probability": probability,
        "crash_risk": crash_risk,
        "confidence": confidence,
    }
    return preds, targets


if __name__ == "__main__":
    key = jax.random.PRNGKey(0)
    k1, k2 = jax.random.split(key)

    # Small batch that exercises lane + sublane padding (100 -> 8x128 tile).
    preds_a, tgt_a = _make_inputs(k1, 100)
    loss_a = jax.block_until_ready(jetx_tft_loss(preds_a, tgt_a))
    ref_a = jax.block_until_ready(_reference_loss(preds_a, tgt_a))
    assert jnp.allclose(loss_a, ref_a, rtol=1e-4, atol=1e-4), (loss_a, ref_a)

    # A second size with several full 128-lane rows.
    preds_b, tgt_b = _make_inputs(k2, 384)
    loss_b = jax.block_until_ready(jetx_tft_loss(preds_b, tgt_b))
    ref_b = jax.block_until_ready(_reference_loss(preds_b, tgt_b))
    assert jnp.allclose(loss_b, ref_b, rtol=1e-4, atol=1e-4), (loss_b, ref_b)

    print("KERNEL_OK")
</pallas_src>

<mosaic_0001>
module attributes {stable_mosaic.version = 11 : i64} {
  func.func @_jetx_tft_loss_kernel(%arg0: i32, %arg1: memref<5x8x128xf32, #tpu.memory_space<vmem>>, %arg2: memref<1x1xf32, #tpu.memory_space<smem>>, %arg3: memref<1xf32, #tpu.memory_space<smem>>) attributes {dimension_semantics = [#tpu.dimension_semantics<arbitrary>], iteration_bounds = array<i64: 1>, scalar_prefetch = 0 : i64, scratch_operands = 1 : i64, tpu.core_type = #tpu.core_type<tc>, window_params = [{transform_indices = @transform_0, window_bounds = array<i64: 5, 8, 128>}, {transform_indices = @transform_1, window_bounds = array<i64: 1, 1>}]} {
    %c0_i32 = arith.constant 0 : i32
    %0 = arith.cmpi eq, %arg0, %c0_i32 : i32
    %1 = arith.extui %0 : i1 to i32
    %c0_i32_0 = arith.constant 0 : i32
    %2 = arith.cmpi ne, %1, %c0_i32_0 : i32
    scf.if %2 {
      %cst_28 = arith.constant 0.000000e+00 : f32
      %c0_29 = arith.constant 0 : index
      %62 = memref.load %arg3[%c0_29] : memref<1xf32, #tpu.memory_space<smem>>
      memref.store %cst_28, %arg3[%c0_29] : memref<1xf32, #tpu.memory_space<smem>>
    } else {
    }
    %c0 = arith.constant 0 : index
    %c0_1 = arith.constant 0 : index
    %c0_2 = arith.constant 0 : index
    %3 = vector.load %arg1[%c0, %c0_1, %c0_2] : memref<5x8x128xf32, #tpu.memory_space<vmem>>, vector<1x8x128xf32>
    %4 = vector.shape_cast %3 : vector<1x8x128xf32> to vector<8x128xf32>
    %c1 = arith.constant 1 : index
    %c0_3 = arith.constant 0 : index
    %c0_4 = arith.constant 0 : index
    %5 = vector.load %arg1[%c1, %c0_3, %c0_4] : memref<5x8x128xf32, #tpu.memory_space<vmem>>, vector<1x8x128xf32>
    %6 = vector.shape_cast %5 : vector<1x8x128xf32> to vector<8x128xf32>
    %c2 = arith.constant 2 : index
    %c0_5 = arith.constant 0 : index
    %c0_6 = arith.constant 0 : index
    %7 = vector.load %arg1[%c2, %c0_5, %c0_6] : memref<5x8x128xf32, #tpu.memory_space<vmem>>, vector<1x8x128xf32>
    %8 = vector.shape_cast %7 : vector<1x8x128xf32> to vector<8x128xf32>
    %c3 = arith.constant 3 : index
    %c0_7 = arith.constant 0 : index
    %c0_8 = arith.constant 0 : index
    %9 = vector.load %arg1[%c3, %c0_7, %c0_8] : memref<5x8x128xf32, #tpu.memory_space<vmem>>, vector<1x8x128xf32>
    %10 = vector.shape_cast %9 : vector<1x8x128xf32> to vector<8x128xf32>
    %c4 = arith.constant 4 : index
    %c0_9 = arith.constant 0 : index
    %c0_10 = arith.constant 0 : index
    %11 = vector.load %arg1[%c4, %c0_9, %c0_10] : memref<5x8x128xf32, #tpu.memory_space<vmem>>, vector<1x8x128xf32>
    %12 = vector.shape_cast %11 : vector<1x8x128xf32> to vector<8x128xf32>
    %cst = arith.constant 1.500000e+00 : f32
    %13 = vector.broadcast %cst : f32 to vector<8x128xf32>
    %14 = arith.cmpf oge, %12, %13 : vector<8x128xf32>
    %15 = arith.subf %4, %12 : vector<8x128xf32>
    %16 = arith.mulf %15, %15 : vector<8x128xf32>
    %cst_11 = arith.constant 6.000000e-01 : f32
    %17 = vector.broadcast %cst_11 : f32 to vector<8x128xf32>
    %18 = arith.mulf %17, %16 : vector<8x128xf32>
    %cst_12 = arith.constant 1.000000e+00 : f32
    %19 = vector.broadcast %cst_12 : f32 to vector<8x128xf32>
    %20 = arith.subf %19, %6 : vector<8x128xf32>
    %21 = arith.select %14, %6, %20 : vector<8x128xi1>, vector<8x128xf32>
    %22 = math.log %21 : vector<8x128xf32>
    %cst_13 = arith.constant -1.000000e+02 : f32
    %23 = vector.broadcast %cst_13 : f32 to vector<8x128xf32>
    %24 = arith.maximumf %22, %23 : vector<8x128xf32>
    %cst_14 = arith.constant 0.000000e+00 : f32
    %25 = vector.broadcast %cst_14 : f32 to vector<8x128xf32>
    %26 = arith.subf %25, %24 : vector<8x128xf32>
    %cst_15 = arith.constant 1.600000e-01 : f32
    %27 = vector.broadcast %cst_15 : f32 to vector<8x128xf32>
    %28 = arith.mulf %27, %26 : vector<8x128xf32>
    %29 = arith.addf %18, %28 : vector<8x128xf32>
    %cst_16 = arith.constant 1.000000e+00 : f32
    %30 = vector.broadcast %cst_16 : f32 to vector<8x128xf32>
    %31 = arith.subf %30, %8 : vector<8x128xf32>
    %32 = arith.select %14, %31, %8 : vector<8x128xi1>, vector<8x128xf32>
    %33 = math.log %32 : vector<8x128xf32>
    %cst_17 = arith.constant -1.000000e+02 : f32
    %34 = vector.broadcast %cst_17 : f32 to vector<8x128xf32>
    %35 = arith.maximumf %33, %34 : vector<8x128xf32>
    %cst_18 = arith.constant 0.000000e+00 : f32
    %36 = vector.broadcast %cst_18 : f32 to vector<8x128xf32>
    %37 = arith.subf %36, %35 : vector<8x128xf32>
    %cst_19 = arith.constant 1.200000e-01 : f32
    %38 = vector.broadcast %cst_19 : f32 to vector<8x128xf32>
    %39 = arith.mulf %38, %37 : vector<8x128xf32>
    %40 = arith.addf %29, %39 : vector<8x128xf32>
    %41 = math.absf %15 : vector<8x128xf32>
    %cst_20 = arith.constant 1.000000e-01 : f32
    %42 = vector.broadcast %cst_20 : f32 to vector<8x128xf32>
    %43 = arith.maximumf %12, %42 : vector<8x128xf32>
    %44 = arith.divf %41, %43 : vector<8x128xf32>
    %cst_21 = arith.constant 1.000000e+00 : f32
    %45 = vector.broadcast %cst_21 : f32 to vector<8x128xf32>
    %46 = arith.subf %45, %44 : vector<8x128xf32>
    %47 = arith.subf %10, %46 : vector<8x128xf32>
    %48 = arith.mulf %47, %47 : vector<8x128xf32>
    %cst_22 = arith.constant 1.200000e-01 : f32
    %49 = vector.broadcast %cst_22 : f32 to vector<8x128xf32>
    %50 = arith.mulf %49, %48 : vector<8x128xf32>
    %51 = arith.addf %40, %50 : vector<8x128xf32>
    %c0_23 = arith.constant 0 : index
    %52 = memref.load %arg3[%c0_23] : memref<1xf32, #tpu.memory_space<smem>>
    %53 = vector.shape_cast %51 : vector<8x128xf32> to vector<1x8x128xf32>
    %cst_24 = arith.constant dense<0.000000e+00> : vector<1xf32>
    %54 = vector.multi_reduction <add>, %53, %cst_24 [1, 2] : vector<1x8x128xf32> to vector<1xf32>
    %55 = vector.shape_cast %54 : vector<1xf32> to vector<1x1x1xf32>
    %56 = vector.extract %55[0, 0, 0] : f32 from vector<1x1x1xf32>
    %57 = arith.addf %52, %56 : f32
    %c0_25 = arith.constant 0 : index
    %58 = memref.load %arg3[%c0_25] : memref<1xf32, #tpu.memory_space<smem>>
    memref.store %57, %arg3[%c0_25] : memref<1xf32, #tpu.memory_space<smem>>
    %c0_i32_26 = arith.constant 0 : i32
    %59 = arith.cmpi eq, %arg0, %c0_i32_26 : i32
    %60 = arith.extui %59 : i1 to i32
    %c0_i32_27 = arith.constant 0 : i32
    %61 = arith.cmpi ne, %60, %c0_i32_27 : i32
    scf.if %61 {
      %c0_28 = arith.constant 0 : index
      %62 = memref.load %arg3[%c0_28] : memref<1xf32, #tpu.memory_space<smem>>
      %cst_29 = arith.constant 0.00999999977 : f32
      %63 = arith.mulf %62, %cst_29 : f32
      %c0_30 = arith.constant 0 : index
      %c0_31 = arith.constant 0 : index
      %64 = memref.load %arg2[%c0_30, %c0_31] : memref<1x1xf32, #tpu.memory_space<smem>>
      memref.store %63, %arg2[%c0_30, %c0_31] : memref<1x1xf32, #tpu.memory_space<smem>>
    } else {
    }
    return
  }
  func.func @transform_0(%arg0: i32) -> (i32, i32, i32) {
    %c0_i32 = arith.constant 0 : i32
    %c0_i32_0 = arith.constant 0 : i32
    %c0_i32_1 = arith.constant 0 : i32
    return %c0_i32, %arg0, %c0_i32_0 : i32, i32, i32
  }
  func.func @transform_1(%arg0: i32) -> (i32, i32) {
    %c0_i32 = arith.constant 0 : i32
    %c0_i32_0 = arith.constant 0 : i32
    %c0_i32_1 = arith.constant 0 : i32
    return %c0_i32, %c0_i32_0 : i32, i32
  }
}

</mosaic_0001>

<bundles_post_ra>
// kernel: tpu_custom_call.1
= control target key start
LH: loop header
LB: loop body
LE: loop exit
PB: predicated region body
PF: predicated region fallthrough
CT: control target
= control target key end

     0   :  { %6 = vsyncpa [#allocation4], 0  ;;  %s187_s0 = inlined_call_operand.hbm [shape: f32[5,8,128], index: 0, kind: input, shape index: {}]   ;;  %s188_s1 = inlined_call_operand.hbm [shape: f32[1,1], index: 1, kind: output, shape index: {}]  }
   0x1   :  { %7 = vsyncpa [#allocation5], 0  ;;  %s149_s6 = smov [#allocation3]   ;;  %s113_s10 = scalar_lea.hbm %s187_s0, 640 }
   0x2   :  { %s13_s7 = sshll.u32 %s149_s6, 4  ;;  %p114_p0 = scmp.ne.s32.totalorder %s187_s0, %s113_s10  ;;  %s14_s7 = int_to_ptr.vmem [resolvable:$true] %s13_s7 }
   0x3   :  { %p117_p1 = scmp.lt.u32.totalorder %s113_s10, %s187_s0 }
   0x5   :  { %p119_p2 = pnand %p117_p1, %p114_p0 }
   0x7   :  { %122 = shalt.err (!%p119_p2)
}
   0x8   :  { %s123_s15 = scalar_lea.vmem %s14_s7, 640  ;;  %p128_p4 = scmp.lt.s32.totalorder %s14_s7, %s14_s7 }
   0x9   :  { %p124_p3 = scmp.ne.s32.totalorder %s14_s7, %s123_s15  ;;  %p129_p5 = scmp.lt.s32.totalorder %s123_s15, %s123_s15 }
   0xb   :  { %p130_p6 = por %p129_p5, %p128_p4 }
   0xd   :  { %p131_p7 = pnand %p130_p6, %p124_p3 }
   0xf   :  { %134 = shalt.err (!%p131_p7)
}
  0x10   :  { %s150_s16 = smov 128   ;;  %s151_s17 = smov 8  }
  0x11   :  { %19 = dma.hbm_to_vmem [thread:$0]  %s187_s0, 640, %s14_s7, [#allocation4], %s150_s16, %s150_s16, %s151_s17  }
  0x12   :  { %145 = dma.done.wait [#allocation4], 640  }
  0x13   :  { %146 = vsyncadd [#allocation4], 4294966656  ;;  %v31_v0 = vld [vmem:[#allocation3 + $0x8] sm:$0xff]  ;;  %v33_v1 = vld [vmem:[#allocation3 + $0x10] sm:$0xff]  ;;  %s135_s23 = scalar_lea.hbm %s188_s1, 16 }
  0x14   :  { %v37_v2 = vld [vmem:[#allocation3 + $0x20] sm:$0xff]  ;;  %v42_v3 = vsub.f32 1.0, %v31_v0  ;;  %v50_v4 = vsub.f32 1.0, %v33_v1  ;;  %v35_v19 = vld [vmem:[#allocation3 + $0x18] sm:$0xff]  ;;  %p136_p8 = scmp.ne.s32.totalorder %s188_s1, %s135_s23  ;;  %p139_p9 = scmp.lt.u32.totalorder %s135_s23, %s188_s1 }
  0x15   :  { %vm38_vm0 = vcmp.ge.f32.partialorder %v37_v2, 1.5  ;;  %v59_v5 = vmax.f32 %v37_v2, 0.1  ;;  %v29_v8 = vld [vmem:[#allocation3] sm:$0xff] }
  0x16   :  { %v43_v6 = vsel %vm38_vm0, %v31_v0, %v42_v3  ;;  %v51_v7 = vsel %vm38_vm0, %v50_v4, %v33_v1  ;;  %v39_v9 = vsub.f32 %v29_v8, %v37_v2  ;;  %p141_p10 = pnand %p139_p9, %p136_p8 }
  0x17   :  { %107 = vlog2.f32 %v43_v6 }
  0x18   :  { %109 = vlog2.f32 %v51_v7  ;;  %v58_v10 = vand.u32 2147483647, %v39_v9  ;;  %v40_v13 = vmul.f32 %v39_v9, %v39_v9 }
  0x19   :  { %111 = vrcp.f32 %v59_v5 }
  0x1a   :  { %v41_v21 = vmul.f32 0.6, %v40_v13 }
  0x21   :  { %v108_v11 = vpop.eup %107 }
  0x22   :  { %v110_v12 = vpop.eup %109  ;;  %v45_v14 = vmul.f32 0.6931472, %v108_v11 }
  0x23   :  { %v112_v15 = vpop.eup %111  ;;  %v53_v16 = vmul.f32 0.6931472, %v110_v12 }
  0x24   :  { %v46_v17 = vmax.f32 %v45_v14, -100.0  ;;  %v61_v18 = vmul.f32 %v112_v15, %v58_v10 }
  0x25   :  { %v54_v20 = vmax.f32 %v53_v16, -100.0 }
  0x26   :  { %v47_v22 = vsub.f32 0.0, %v46_v17  ;;  %v62_v23 = vsub.f32 1.0, %v61_v18 }
  0x27   :  { %v55_v24 = vsub.f32 0.0, %v54_v20 }
  0x28   :  { %v48_v25 = vmul.f32 0.16, %v47_v22  ;;  %v63_v26 = vsub.f32 %v35_v19, %v62_v23 }
  0x29   :  { %v56_v27 = vmul.f32 0.12, %v55_v24 }
  0x2a   :  { %v49_v28 = vadd.f32 %v48_v25, %v41_v21  ;;  %v64_v29 = vmul.f32 %v63_v26, %v63_v26 }
  0x2c   :  { %v57_v30 = vadd.f32 %v56_v27, %v49_v28  ;;  %v65_v31 = vmul.f32 0.12, %v64_v29 }
  0x2e   :  { %v66_v32 = vadd.f32 %v65_v31, %v57_v30 }
  0x30   :  { %68 = vadd.xlane.f32.xlu0 %v66_v32 }
  0xbd   :  { %v69_v33 = vpop.xlane.xlu0 %68 }
  0xbe   :  { %v70_v34 = vrot.slane %v69_v33, 4 }
  0xc0   :  { %v71_v35 = vadd.f32 %v70_v34, %v69_v33 }
  0xc2   :  { %v72_v36 = vrot.slane %v71_v35, 2 }
  0xc4   :  { %v73_v37 = vadd.f32 %v72_v36, %v71_v35 }
  0xc6   :  { %v74_v38 = vrot.slane %v73_v37, 1 }
  0xc8   :  { %v75_v39 = vadd.f32 %v74_v38, %v73_v37 }
  0xca   :  { %101 = vpush %v75_v39 }
  0xfb   :  { %s102_s0 = spop %101 }
  0xfc   :  { %s84_s20 = smul.f32 0.01, %s102_s0 }
  0xfe   :  { %86 = sst [smem:[#allocation6]] %s84_s20 }
  0xff   :  { %144 = shalt.err (!%p141_p10)
}
 0x100   :  { %s152_s28 = smov [#allocation6]  }
 0x101   :  { %94 = dma.smem_to_hbm %s152_s28, 16, %s188_s1, [#allocation5]  }
 0x102   :  { %147 = dma.done.wait [#allocation5], 16  }
 0x103   :  { %148 = vsyncadd [#allocation5], 4294967280 }
 0x104   :  { %98 = sfence }
 0x105   :  { %99 = vsyncpa [#allocation4], 1 }
 0x106   :  { %100 = vsyncpa [#allocation5], 1 }

</bundles_post_ra>
